<compile_context>
chip_gen: v7x
topology: tpu7x:2x2x1
jax: 0.10.0
libtpu: 0.0.40
codegen_flags: <defaults>
</compile_context>

<pallas_src>
import functools

import jax
import jax.numpy as jnp
from jax.experimental import pallas as pl
from jax.experimental.pallas import tpu as pltpu

_LANE = 128
_SUBLANE = 8


def _round_up(x, m):
    return ((x + m - 1) // m) * m


def _sentence_maxpool_kernel(x_ref, w_ref, b_ref, o_ref, *,
                             bt, t, t_pad, tn, out_pad, relu):
    """One grid step: (bt*t_pad, D) @ (D, tn) -> max over t -> + bias -> relu."""
    j = pl.program_id(1)

    # Single MXU matmul for the whole batch chunk (M = bt * t_pad rows).
    y = jnp.dot(x_ref[...], w_ref[...],
                preferred_element_type=jnp.float32)            # (bt*t_pad, tn)
    y = y.reshape(bt, t_pad, tn)                               # sublane-aligned split

    if t_pad != t:
        # Padded sequence rows must never win the max (bias is added after it).
        row = jax.lax.broadcasted_iota(jnp.int32, (bt, t_pad, tn), 1)
        y = jnp.where(row < t, y, -jnp.inf)

    m = jnp.max(y, axis=1)                                     # (bt, tn)

    # Bias is resident (fetched once for the whole grid); pick this tile's lanes.
    if tn == out_pad:
        bias = b_ref[...]
    else:
        bias = b_ref[:, pl.ds(pl.multiple_of(j * tn, tn), tn)]
    m = m + bias                                               # bias after max (exact)

    if relu:
        m = jnp.maximum(m, 0.0)
    o_ref[...] = m.astype(o_ref.dtype)


def sentence_maxpool(x, weight, bias, relu=True, *, mxu_dtype=None):
    """y = relu(max_t(x @ W.T + b)).

    x: (B, T, D) f32; weight: (OUT, D) (PyTorch Linear layout); bias: (OUT,).
    mxu_dtype: optionally jnp.bfloat16 (cast in the wrapper -> half the HBM
               traffic on x and W); None keeps full f32 numerics.
    """
    B, T, D = x.shape
    OUT = weight.shape[0]

    in_bytes = 4 if mxu_dtype is None else jnp.dtype(mxu_dtype).itemsize

    # ---- tiling -----------------------------------------------------------
    VMEM_BUDGET = 24 << 20           # conservative across v5e / v6e / v7x

    t_pad = _round_up(T, _SUBLANE)
    out_pad = _round_up(OUT, _LANE)

    # Output-lane tiling: keep the weight fully resident (DMA'd exactly once)
    # when it fits; otherwise tile OUT and pad it UP to a multiple of the tile
    # (never shrink the tile down to 128 just to find a divisor).
    if 2 * D * out_pad * in_bytes <= VMEM_BUDGET // 2:
        tn = out_pad
    else:
        tn = 512
        while tn > 128 and 2 * D * tn * in_bytes > (8 << 20):
            tn //= 2
        tn = min(tn, out_pad)
        out_pad = _round_up(out_pad, tn)
    # TODO(synk): for very large D, add a trailing "arbitrary" K grid axis with
    # a VMEM f32 accumulator (pl.when init/finalize) so v5e/v7x blocks stay small.

    # Batch chunk: target ~1024 MXU rows per step; bt must be a multiple of 8
    # so the (bt, tn) output block satisfies the (8, 128) rule; capped by the
    # (padded) batch size and by the VMEM budget.
    TARGET_M = 1024
    bt = max(_SUBLANE, _round_up(pl.cdiv(TARGET_M, t_pad), _SUBLANE))
    bt = min(bt, _round_up(B, _SUBLANE))
    fixed = 2 * D * tn * in_bytes + 2 * out_pad * 4
    while bt > _SUBLANE and (2 * bt * t_pad * D * in_bytes
                             + 2 * bt * tn * 4 + fixed) > VMEM_BUDGET:
        bt -= _SUBLANE
    b_pad = _round_up(B, bt)

    vmem_need = (2 * bt * t_pad * D * in_bytes   # x (double-buffered)
                 + 2 * D * tn * in_bytes         # weight
                 + 2 * out_pad * 4               # bias (resident)
                 + 2 * bt * tn * 4)              # output
    vmem_limit = int(min(48 << 20, max(32 << 20, 2 * vmem_need)))

    # ---- wrapper-side layout plumbing (cheap one-time XLA ops) -------------
    x_p = x
    if b_pad != B or t_pad != T:
        x_p = jnp.pad(x, ((0, b_pad - B), (0, t_pad - T), (0, 0)))
    x2 = x_p.reshape(b_pad * t_pad, D)

    w_t = weight.T                                              # (D, OUT)
    if out_pad != OUT:
        w_t = jnp.pad(w_t, ((0, 0), (0, out_pad - OUT)))
        b2 = jnp.pad(bias, (0, out_pad - OUT)).reshape(1, out_pad)
    else:
        b2 = bias.reshape(1, out_pad)
    b2 = b2.astype(jnp.float32)

    if mxu_dtype is not None:
        # Cast in the wrapper: HBM->VMEM DMA moves half the bytes and the
        # kernel does no per-step VPU casts (bias / outputs stay f32).
        x2 = x2.astype(mxu_dtype)
        w_t = w_t.astype(mxu_dtype)

    kernel = functools.partial(
        _sentence_maxpool_kernel, bt=bt, t=T, t_pad=t_pad, tn=tn,
        out_pad=out_pad, relu=relu)

    grid = (b_pad // bt, out_pad // tn)
    out = pl.pallas_call(
        kernel,
        out_shape=jax.ShapeDtypeStruct((b_pad, out_pad), jnp.float32),
        grid_spec=pltpu.PrefetchScalarGridSpec(
            num_scalar_prefetch=0,
            grid=grid,
            in_specs=[
                # x chunk: constant over j => fetched once per batch chunk.
                pl.BlockSpec((bt * t_pad, D), lambda i, j: (i, 0)),
                # weight tile: with tn == out_pad its block index is constant
                # over the whole grid => fetched exactly once.
                pl.BlockSpec((D, tn), lambda i, j: (0, j)),
                # full bias, resident for the whole grid.
                pl.BlockSpec((1, out_pad), lambda i, j: (0, 0)),
            ],
            out_specs=pl.BlockSpec((bt, tn), lambda i, j: (i, j)),
        ),
        compiler_params=pltpu.CompilerParams(
            # Batch axis "parallel": a v7x megacore shards i, so each core
            # streams its own x chunks and only the small weight is duplicated.
            dimension_semantics=("parallel", "arbitrary"),
            vmem_limit_bytes=vmem_limit,
        ),
        cost_estimate=pl.CostEstimate(
            flops=2 * b_pad * t_pad * D * out_pad,
            transcendentals=0,
            bytes_accessed=(in_bytes * (b_pad * t_pad * D + D * out_pad)
                            + 4 * (out_pad + b_pad * out_pad)),
        ),
    )(x2, w_t, b2)

    # Drop batch / lane padding.
    return out[:B, :OUT]


if __name__ == "__main__":
    # Shapes consistent with the module's forward:
    # batch=2, seq=8, word_dimension=32, output_dim=64.
    B, T, D, OUT = 2, 8, 32, 64

    key = jax.random.PRNGKey(0)
    kx, kw, kb = jax.random.split(key, 3)

    x = jax.random.normal(kx, (B, T, D), dtype=jnp.float32)
    # Deterministic synthetic Linear parameters (PyTorch layout: (OUT, D)).
    weight = jax.random.normal(kw, (OUT, D), dtype=jnp.float32) * 0.1
    bias = jax.random.normal(kb, (OUT,), dtype=jnp.float32) * 0.1

    out = jax.block_until_ready(sentence_maxpool(x, weight, bias, relu=True))

    # Reference in plain JAX (full-precision matmul so the comparison is tight).
    ref_pre = jnp.einsum("btd,od->bto", x, weight,
                         precision=jax.lax.Precision.HIGHEST) + bias
    ref = jnp.maximum(jnp.max(ref_pre, axis=1), 0.0)
    assert out.shape == (B, OUT)
    assert jnp.allclose(out, ref, atol=1e-4, rtol=1e-4)

    # relu=False branch of the module.
    out_nr = jax.block_until_ready(sentence_maxpool(x, weight, bias, relu=False))
    ref_nr = jnp.max(ref_pre, axis=1)
    assert jnp.allclose(out_nr, ref_nr, atol=1e-4, rtol=1e-4)

    # Non-aligned shapes (T % 8 != 0, OUT % 128 != 0) exercise the seq-masking
    # and padding paths.
    B2, T2, D2, OUT2 = 5, 6, 48, 200
    x_b = jax.random.normal(kx, (B2, T2, D2), dtype=jnp.float32)
    w_b = jax.random.normal(kw, (OUT2, D2), dtype=jnp.float32) * 0.1
    bz_b = jax.random.normal(kb, (OUT2,), dtype=jnp.float32) * 0.1
    o_b = jax.block_until_ready(sentence_maxpool(x_b, w_b, bz_b, relu=False))
    r_b = jnp.max(jnp.einsum("btd,od->bto", x_b, w_b,
                             precision=jax.lax.Precision.HIGHEST) + bz_b, axis=1)
    assert o_b.shape == (B2, OUT2)
    assert jnp.allclose(o_b, r_b, atol=1e-4, rtol=1e-4)

    print("KERNEL_OK")
</pallas_src>

<mosaic_0001>
module attributes {stable_mosaic.version = 11 : i64} {
  func.func @_sentence_maxpool_kernel(%arg0: i32, %arg1: i32, %arg2: memref<64x32xf32, #tpu.memory_space<vmem>>, %arg3: memref<32x128xf32, #tpu.memory_space<vmem>>, %arg4: memref<1x128xf32, #tpu.memory_space<vmem>>, %arg5: memref<8x128xf32, #tpu.memory_space<vmem>>) attributes {dimension_semantics = [#tpu.dimension_semantics<parallel>, #tpu.dimension_semantics<arbitrary>], iteration_bounds = array<i64: 1, 1>, scalar_prefetch = 0 : i64, scratch_operands = 0 : i64, tpu.core_type = #tpu.core_type<tc>, window_params = [{transform_indices = @transform_0, window_bounds = array<i64: 64, 32>}, {transform_indices = @transform_1, window_bounds = array<i64: 32, 128>}, {pipeline_mode = #tpu.pipeline_mode<synchronous>, transform_indices = @transform_2, window_bounds = array<i64: 1, 128>}, {transform_indices = @transform_3, window_bounds = array<i64: 8, 128>}]} {
    %c0 = arith.constant 0 : index
    %c0_0 = arith.constant 0 : index
    %0 = vector.load %arg2[%c0, %c0_0] : memref<64x32xf32, #tpu.memory_space<vmem>>, vector<64x32xf32>
    %c0_1 = arith.constant 0 : index
    %c0_2 = arith.constant 0 : index
    %1 = vector.load %arg3[%c0_1, %c0_2] : memref<32x128xf32, #tpu.memory_space<vmem>>, vector<32x128xf32>
    %cst = arith.constant dense<0.000000e+00> : vector<64x128xf32>
    %2 = tpu.matmul %0, %1, %cst {dimension_numbers = #tpu.dot_dimension_numbers<[1], [0], [0], [1], [0, 0, 1, 1], [], []>} : vector<64x32xf32>, vector<32x128xf32>, vector<64x128xf32> -> vector<64x128xf32>
    %3 = vector.shape_cast %2 : vector<64x128xf32> to vector<8x8x128xf32>
    %cst_3 = arith.constant dense<0xFF800000> : vector<8x128xf32>
    %4 = vector.multi_reduction <maximumf>, %3, %cst_3 [1] : vector<8x8x128xf32> to vector<8x128xf32>
    %c0_4 = arith.constant 0 : index
    %c0_5 = arith.constant 0 : index
    %5 = vector.load %arg4[%c0_4, %c0_5] : memref<1x128xf32, #tpu.memory_space<vmem>>, vector<1x128xf32>
    %6 = vector.broadcast %5 : vector<1x128xf32> to vector<8x128xf32>
    %7 = arith.addf %4, %6 : vector<8x128xf32>
    %cst_6 = arith.constant 0.000000e+00 : f32
    %8 = vector.broadcast %cst_6 : f32 to vector<8x128xf32>
    %9 = arith.maximumf %7, %8 : vector<8x128xf32>
    %c0_7 = arith.constant 0 : index
    %c0_8 = arith.constant 0 : index
    %10 = vector.load %arg5[%c0_7, %c0_8] : memref<8x128xf32, #tpu.memory_space<vmem>>, vector<8x128xf32>
    tpu.vector_store %arg5[%c0_7, %c0_8], %9 {strides = array<i32>} : memref<8x128xf32, #tpu.memory_space<vmem>>, vector<8x128xf32>,
    return
  }
  func.func @transform_0(%arg0: i32, %arg1: i32) -> (i32, i32) {
    %c0_i32 = arith.constant 0 : i32
    %c0_i32_0 = arith.constant 0 : i32
    return %arg0, %c0_i32 : i32, i32
  }
  func.func @transform_1(%arg0: i32, %arg1: i32) -> (i32, i32) {
    %c0_i32 = arith.constant 0 : i32
    %c0_i32_0 = arith.constant 0 : i32
    return %c0_i32, %arg1 : i32, i32
  }
  func.func @transform_2(%arg0: i32, %arg1: i32) -> (i32, i32) {
    %c0_i32 = arith.constant 0 : i32
    %c0_i32_0 = arith.constant 0 : i32
    %c0_i32_1 = arith.constant 0 : i32
    return %c0_i32, %c0_i32_0 : i32, i32
  }
  func.func @transform_3(%arg0: i32, %arg1: i32) -> (i32, i32) {
    %c0_i32 = arith.constant 0 : i32
    return %arg0, %arg1 : i32, i32
  }
}

</mosaic_0001>

<bundles_post_ra>
// kernel: tpu_custom_call.1
= control target key start
LH: loop header
LB: loop body
LE: loop exit
PB: predicated region body
PF: predicated region fallthrough
CT: control target
= control target key end

     0   :  { %vm27_vm0 = vcmask 261120   ;;  %s431_s0 = inlined_call_operand.vmem [shape: f32[64,32], index: 0, kind: input, shape index: {}]   ;;  %s432_s1 = inlined_call_operand.vmem [shape: f32[32,128], index: 1, kind: input, shape index: {}]   ;;  %s433_s2 = inlined_call_operand.vmem [shape: f32[1,128], index: 2, kind: input, shape index: {}]   ;;  %s434_s3 = inlined_call_operand.hbm [shape: f32[8,128], index: 3, kind: output, shape index: {}]  }
   0x1   :  { %v23_v0 = vld [vmem:[%s432_s1] sm:$0xff]  ;;  %v24_v1 = vld [vmem:[%s432_s1 + $0x8] sm:$0xff]  ;;  %v25_v2 = vld [vmem:[%s432_s1 + $0x10] sm:$0xff] }
   0x2   :  { %v314_v3 = vpack.c.bf16 %v24_v1, %v23_v0  ;;  %v26_v4 = vld [vmem:[%s432_s1 + $0x18] sm:$0xff]  ;;  %v15_v5 = vld [vmem:[%s431_s0] sm:$0xff] }
   0x3   :  { %v19_v6 = vld [vmem:[%s431_s0 + $0x20] sm:$0xff]  ;;  %v318_v7 = vpack.c.bf16 %v26_v4, %v25_v2  ;;  %302 = vmatprep.mubr.msk.f32.mxu0 %vm27_vm0, %v15_v5 }
   0x4   :  { %308 = vmatprep.mubr.msk.f32.mxu1 %vm27_vm0, %v19_v6  ;;  %315 = vmatprep.subr.bf16.mxu0 %v314_v3 }
   0x5   :  { %322 = vmatprep.subr.bf16.mxu1 %v314_v3  ;;  %317 = vmatpush3.bf16.msra.mxu0 %v314_v3 }
   0x6   :  { %324 = vmatpush3.bf16.msra.mxu1 %v314_v3 }
   0x7   :  { %8 = vsyncpa [#allocation3], 0  ;;  %319 = vmatprep.subr.bf16.mxu0 %v318_v7  ;;  %323 = vmatprep.subr.bf16.mxu1 %v318_v7  ;;  %v16_v8 = vld [vmem:[%s431_s0 + $0x8] sm:$0xff]  ;;  %v17_v10 = vld [vmem:[%s431_s0 + $0x10] sm:$0xff]  ;;  %vm237_vm1 = vcmask 1041409   ;;  %vm240_vm2 = vcmask 1042434  }
   0x8   :  { %v20_v9 = vld [vmem:[%s431_s0 + $0x28] sm:$0xff]  ;;  %v21_v11 = vld [vmem:[%s431_s0 + $0x30] sm:$0xff]  ;;  %v18_v12 = vld [vmem:[%s431_s0 + $0x18] sm:$0xff]  ;;  %vm243_vm3 = vcmask 1043459   ;;  %vm246_vm4 = vcmask 1044484   ;;  %vm249_vm5 = vcmask 1045509  }
   0x9   :  { %321 = vmatpush3.bf16.msra.mxu0 %v318_v7  ;;  %v22_v13 = vld [vmem:[%s431_s0 + $0x38] sm:$0xff]  ;;  %v281_v50 = vld [vmem:[%s433_s2] ss:$0 sm:$0xff]  ;;  %vm252_vm6 = vcmask 1046534   ;;  %s351_s2 = smov [#allocation2]   ;;  %vm255_vm7 = vcmask 1047559  }
   0xa   :  { %325 = vmatpush3.bf16.msra.mxu1 %v318_v7  ;;  %s265_s9 = sshll.u32 %s351_s2, 4  ;;  %s266_s9 = int_to_ptr.vmem [resolvable:$true] %s265_s9 }
   0xb   :  { %s327_s10 = scalar_lea.vmem %s266_s9, 128  ;;  %p332_p1 = scmp.lt.s32.totalorder %s266_s9, %s266_s9 }
   0xc   :  { %303 = vmatmul.mubr.msk.f32.vlgmr.msra.gmra.mrb[0].mxu0 %vm27_vm0, %v16_v8  ;;  %p328_p0 = scmp.ne.s32.totalorder %s266_s9, %s327_s10  ;;  %p333_p2 = scmp.lt.s32.totalorder %s327_s10, %s327_s10 }
   0xd   :  { %309 = vmatmul.mubr.msk.f32.vlgmr.msra.gmra.mrb[0].mxu1 %vm27_vm0, %v20_v9  ;;  %305 = vmatprep.mubr.msk.f32.mxu0 %vm27_vm0, %v17_v10 }
   0xe   :  { %311 = vmatprep.mubr.msk.f32.mxu1 %vm27_vm0, %v21_v11  ;;  %p334_p3 = por %p333_p2, %p332_p1 }
  0x10   :  { %306 = vmatmul.mubr.msk.f32.gmra.mrb[2].mxu0 %vm27_vm0, %v18_v12  ;;  %p335_p4 = pnand %p334_p3, %p328_p0 }
  0x11   :  { %312 = vmatmul.mubr.msk.f32.gmra.mrb[2].mxu1 %vm27_vm0, %v22_v13 }
  0xdf   :  { %v304_v14 = vpop.f32.mrb[0].mxu0 }
  0xe0   :  { %v310_v15 = vpop.f32.mrb[0].mxu1  ;;  %v163_v16 = vrot.slane %v304_v14, 4  ;;  %v118_v18 = vpop.f32.mrb[1].mxu0 }
  0xe1   :  { %v187_v17 = vrot.slane %v310_v15, 4  ;;  %v138_v19 = vpop.f32.mrb[1].mxu1  ;;  %v157_v20 = vrot.slane %v118_v18, 4 }
  0xe2   :  { %v181_v21 = vrot.slane %v138_v19, 4  ;;  %v164_v22 = vmax.f32 %v304_v14, %v163_v16 }
  0xe3   :  { %v188_v23 = vmax.f32 %v310_v15, %v187_v17  ;;  %v158_v24 = vmax.f32 %v118_v18, %v157_v20  ;;  %v307_v26 = vpop.f32.mrb[2].mxu0 }
  0xe4   :  { %v182_v25 = vmax.f32 %v138_v19, %v181_v21  ;;  %v313_v27 = vpop.f32.mrb[2].mxu1  ;;  %v165_v28 = vrot.slane %v164_v22, 2  ;;  %v175_v30 = vrot.slane %v307_v26, 4  ;;  %v128_v32 = vpop.f32.mrb[3].mxu0 }
  0xe5   :  { %v189_v29 = vrot.slane %v188_v23, 2  ;;  %v199_v31 = vrot.slane %v313_v27, 4  ;;  %v148_v33 = vpop.f32.mrb[3].mxu1  ;;  %v159_v34 = vrot.slane %v158_v24, 2  ;;  %v169_v36 = vrot.slane %v128_v32, 4 }
  0xe6   :  { %v183_v35 = vrot.slane %v182_v25, 2  ;;  %v193_v37 = vrot.slane %v148_v33, 4  ;;  %v166_v38 = vmax.f32 %v164_v22, %v165_v28  ;;  %v176_v40 = vmax.f32 %v307_v26, %v175_v30 }
  0xe7   :  { %v190_v39 = vmax.f32 %v188_v23, %v189_v29  ;;  %v200_v41 = vmax.f32 %v313_v27, %v199_v31  ;;  %v160_v42 = vmax.f32 %v158_v24, %v159_v34  ;;  %v170_v44 = vmax.f32 %v128_v32, %v169_v36 }
  0xe8   :  { %v184_v43 = vmax.f32 %v182_v25, %v183_v35  ;;  %v194_v45 = vmax.f32 %v148_v33, %v193_v37  ;;  %v167_v46 = vrot.slane %v166_v38, 1  ;;  %v177_v48 = vrot.slane %v176_v40, 2 }
  0xe9   :  { %v191_v47 = vrot.slane %v190_v39, 1  ;;  %v201_v49 = vrot.slane %v200_v41, 2  ;;  %v161_v51 = vrot.slane %v160_v42, 1  ;;  %v171_v53 = vrot.slane %v170_v44, 2 }
  0xea   :  { %v185_v52 = vrot.slane %v184_v43, 1  ;;  %v195_v54 = vrot.slane %v194_v45, 2  ;;  %v168_v55 = vmax.f32 %v166_v38, %v167_v46  ;;  %v178_v56 = vmax.f32 %v176_v40, %v177_v48 }
  0xeb   :  { %v202_v57 = vmax.f32 %v200_v41, %v201_v49  ;;  %v162_v58 = vmax.f32 %v160_v42, %v161_v51  ;;  %v172_v60 = vmax.f32 %v170_v44, %v171_v53  ;;  %v192_v63 = vmax.f32 %v190_v39, %v191_v47 }
  0xec   :  { %v186_v59 = vmax.f32 %v184_v43, %v185_v52  ;;  %v196_v61 = vmax.f32 %v194_v45, %v195_v54  ;;  %v213_v62 = vadd.f32 %v281_v50, %v168_v55  ;;  %v179_v0 = vrot.slane %v178_v56, 1 }
  0xed   :  { %v203_v1 = vrot.slane %v202_v57, 1  ;;  %v212_v2 = vadd.f32 %v281_v50, %v162_v58  ;;  %v173_v3 = vrot.slane %v172_v60, 1  ;;  %v217_v13 = vadd.f32 %v281_v50, %v192_v63 }
  0xee   :  { %v197_v4 = vrot.slane %v196_v61, 1  ;;  %v221_v5 = vmax.f32 %v213_v62, 0.0  ;;  %v180_v6 = vmax.f32 %v178_v56, %v179_v0  ;;  %v216_v9 = vadd.f32 %v281_v50, %v186_v59 }
  0xef   :  { %v204_v7 = vmax.f32 %v202_v57, %v203_v1  ;;  %v220_v8 = vmax.f32 %v212_v2, 0.0  ;;  %v174_v10 = vmax.f32 %v172_v60, %v173_v3  ;;  %v225_v22 = vmax.f32 %v217_v13, 0.0 }
  0xf0   :  { %v198_v11 = vmax.f32 %v196_v61, %v197_v4  ;;  %v236_v12 = vrot.slane %v221_v5, 7  ;;  %v215_v14 = vadd.f32 %v281_v50, %v180_v6  ;;  %v224_v20 = vmax.f32 %v216_v9, 0.0 }
  0xf1   :  { %v214_v15 = vadd.f32 %v281_v50, %v174_v10  ;;  %v219_v19 = vadd.f32 %v281_v50, %v204_v7  ;;  %v248_v29 = vrot.slane %v225_v22, 3 }
  0xf2   :  { %v218_v16 = vadd.f32 %v281_v50, %v198_v11  ;;  %v238_v17 = vsel %vm237_vm1, %v236_v12, %v220_v8  ;;  %v223_v18 = vmax.f32 %v215_v14, 0.0  ;;  %v245_v27 = vrot.slane %v224_v20, 4 }
  0xf3   :  { %v222_v21 = vmax.f32 %v214_v15, 0.0  ;;  %v227_v26 = vmax.f32 %v219_v19, 0.0 }
  0xf4   :  { %v226_v24 = vmax.f32 %v218_v16, 0.0  ;;  %v242_v25 = vrot.slane %v223_v18, 5 }
  0xf5   :  { %v239_v23 = vrot.slane %v222_v21, 6  ;;  %v254_v34 = vrot.slane %v227_v26, 1 }
  0xf6   :  { %v251_v31 = vrot.slane %v226_v24, 2 }
  0xf7   :  { %v241_v28 = vsel %vm240_vm2, %v239_v23, %v238_v17 }
  0xf8   :  { %v244_v30 = vsel %vm243_vm3, %v242_v25, %v241_v28 }
  0xf9   :  { %v247_v32 = vsel %vm246_vm4, %v245_v27, %v244_v30 }
  0xfa   :  { %v250_v33 = vsel %vm249_vm5, %v248_v29, %v247_v32 }
  0xfb   :  { %v253_v35 = vsel %vm252_vm6, %v251_v31, %v250_v33 }
  0xfc   :  { %v256_v36 = vsel %vm255_vm7, %v254_v34, %v253_v35 }
  0xfd   :  { %258 = vst [vmem:[#allocation2] sm:$0xff] %v256_v36 }
  0xfe   :  { %338 = shalt.err (!%p335_p4)
}
  0xff   :  { %s339_s13 = scalar_lea.hbm %s434_s3, 128 }
 0x100   :  { %p340_p5 = scmp.ne.s32.totalorder %s434_s3, %s339_s13  ;;  %p343_p6 = scmp.lt.u32.totalorder %s339_s13, %s434_s3 }
 0x102   :  { %p345_p7 = pnand %p343_p6, %p340_p5 }
 0x104   :  { %348 = shalt.err (!%p345_p7)
}
 0x105   :  { %268 = dma.vmem_to_hbm [thread:$0]  %s266_s9, 128, %s434_s3, [#allocation3]  }
 0x106   :  { %349 = dma.done.wait [#allocation3], 128  }
 0x107   :  { %350 = vsyncadd [#allocation3], 4294967168 }
 0x108   :  { %272 = vsyncpa [#allocation3], 1 }

</bundles_post_ra>
